<compile_context>
chip_gen: v7x
topology: tpu7x:2x2x1
jax: 0.10.0
libtpu: 0.0.40
codegen_flags: <defaults>
</compile_context>

<pallas_src>
import jax
import jax.numpy as jnp
from jax.experimental import pallas as pl
from jax.experimental.pallas import tpu as pltpu
import numpy as np


def _gnn_kernel(x_ref, w1_ref, b1_ref, w2_ref, b2_ref, out_ref):
    # x_ref:  (Bt, N, F)  cols 0:F-3 node features, cols F-3/F-2/F-1 =
    #                     is_player / is_ball / is_brick flags (exact 1.0).
    # w1_ref: (F-3, H)  b1_ref: (1, H)
    # w2_ref: (H, O)    b2_ref: (1, O)
    # out_ref: (Bt, O)
    x = x_ref[...]
    n = x.shape[1]
    fdim = x.shape[2]
    in_dim = w1_ref.shape[0]

    core = x[:, :, 0:in_dim]                                        # (Bt, N, 5)
    m_player = (x[:, :, fdim - 3:fdim - 2] == 1.0).astype(jnp.float32)  # (Bt,N,1)
    m_ball = (x[:, :, fdim - 2:fdim - 1] == 1.0).astype(jnp.float32)
    m_brick = (x[:, :, fdim - 1:fdim] == 1.0).astype(jnp.float32)

    # Degrees of A_tilde = A + I for the star graph:
    #   ball: 2 + #bricks, player: 2, brick: 2, isolated node: 1.
    n_bricks = jnp.sum(m_brick, axis=1, keepdims=True)              # (Bt, 1, 1)
    deg = 1.0 + m_ball * (1.0 + n_bricks) + m_player + m_brick      # (Bt, N, 1)
    dinv = 1.0 / jnp.sqrt(deg)                                      # (Bt, N, 1)

    # --- Layer 1: ReLU(A_hat @ (X @ W1) + b1) -----------------------------
    # X @ W1 with K=5: unrolled broadcast FMAs (VPU), no batch-fold reshape.
    w1 = w1_ref[...]                                                # (5, H)
    xw1 = core[:, :, 0:1] * w1[0][None, None, :]
    for f in range(1, in_dim):
        xw1 = xw1 + core[:, :, f:f + 1] * w1[f][None, None, :]      # (Bt, N, H)

    # Closed-form A_hat @ y for the symmetric-normalised star graph:
    #   (A_hat y)_i = dinv_i * (z_i + sum_{j in N(i)} z_j),  z = dinv * y.
    z = dinv * xw1
    s_ball = jnp.sum(m_ball * z, axis=1, keepdims=True)             # (Bt, 1, H)
    s_play = jnp.sum(m_player * z, axis=1, keepdims=True)
    s_brk = jnp.sum(m_brick * z, axis=1, keepdims=True)
    nbr = m_ball * (s_play + s_brk) + (m_player + m_brick) * s_ball
    h1 = jnp.maximum(dinv * (z + nbr) + b1_ref[...], 0.0)           # (Bt, N, H)

    # --- Layer 2 propagate + mean pool collapsed ---------------------------
    # mean_i (A_hat @ (H1 W2) + b2)_i
    #   = ((1/N) * sum_j colsum_j(A_hat) * H1_j) @ W2 + b2
    # with colsum_j(A_hat) = dinv_j * (dinv_j + sum_{i in N(j)} dinv_i).
    d_ball = jnp.sum(m_ball * dinv, axis=1, keepdims=True)          # (Bt, 1, 1)
    d_play = jnp.sum(m_player * dinv, axis=1, keepdims=True)
    d_brk = jnp.sum(m_brick * dinv, axis=1, keepdims=True)
    nbr_d = m_ball * (d_play + d_brk) + (m_player + m_brick) * d_ball
    w_pool = dinv * (dinv + nbr_d)                                  # (Bt, N, 1)

    pooled = jnp.sum(w_pool * h1, axis=1) * (1.0 / n)               # (Bt, H)

    out_ref[...] = (jnp.dot(pooled, w2_ref[...],
                            preferred_element_type=jnp.float32)
                    + b2_ref[...])                                  # (Bt, O)


def gnn_forward(x, w1, b1, w2, b2, *, batch_tile=None):
    """x: (B, N, 8) float32. Returns (B, output_dim) float32."""
    b, n, fdim = x.shape
    in_dim, h = w1.shape
    o = w2.shape[1]

    # Largest batch tile <= requested (default 1024) that evenly covers B and
    # keeps the (8,128)-aligned output block; otherwise one whole-batch step.
    if batch_tile is None:
        batch_tile = 1024
    bt = b if b <= batch_tile else batch_tile
    if b % bt or (bt != b and bt % 8):
        bt = b  # TODO(synk): pad B to a tile multiple for ragged production batches.
    grid = (b // bt,)

    b1_2d = b1.reshape(1, h).astype(jnp.float32)
    b2_2d = b2.reshape(1, o).astype(jnp.float32)

    return pl.pallas_call(
        _gnn_kernel,
        out_shape=jax.ShapeDtypeStruct((b, o), jnp.float32),
        grid=grid,
        in_specs=[
            pl.BlockSpec((bt, n, fdim), lambda i: (i, 0, 0)),   # x: batch tiled
            pl.BlockSpec((in_dim, h), lambda i: (0, 0)),        # weights resident
            pl.BlockSpec((1, h), lambda i: (0, 0)),
            pl.BlockSpec((h, o), lambda i: (0, 0)),
            pl.BlockSpec((1, o), lambda i: (0, 0)),
        ],
        out_specs=pl.BlockSpec((bt, o), lambda i: (i, 0)),
        compiler_params=pltpu.CompilerParams(
            dimension_semantics=("parallel",),
            vmem_limit_bytes=48 * 1024 * 1024),
    )(x.astype(jnp.float32), w1.astype(jnp.float32), b1_2d,
      w2.astype(jnp.float32), b2_2d)


def gnn_reference(x, w1, b1, w2, b2):
    """Pure-JAX dense-adjacency reference of the same forward pass."""
    core = x[:, :, :5].astype(jnp.float32)
    player = (x[:, :, 5] == 1.0).astype(jnp.float32)   # (B, N)
    ball = (x[:, :, 6] == 1.0).astype(jnp.float32)
    brick = (x[:, :, 7] == 1.0).astype(jnp.float32)
    n = x.shape[1]

    adj = (ball[:, :, None] * player[:, None, :]
           + player[:, :, None] * ball[:, None, :]
           + ball[:, :, None] * brick[:, None, :]
           + brick[:, :, None] * ball[:, None, :])
    a_tilde = adj + jnp.eye(n, dtype=jnp.float32)[None]
    deg = jnp.sum(a_tilde, axis=2, keepdims=True)
    dinv = 1.0 / jnp.sqrt(deg)
    a_hat = dinv * a_tilde * jnp.swapaxes(dinv, 1, 2)

    h1 = jax.nn.relu(a_hat @ (core @ w1) + b1[None, None, :])
    h2 = a_hat @ (h1 @ w2) + b2[None, None, :]
    return jnp.mean(h2, axis=1)


if __name__ == "__main__":
    batch, num_nodes = 2, 8
    hidden_dim, output_dim = 32, 16

    key = jax.random.PRNGKey(0)
    k_feat, k_w1, k_w2 = jax.random.split(key, 3)

    # 5 core features + [is_player, is_ball, is_brick] flags.
    core = jax.random.normal(k_feat, (batch, num_nodes, 5), dtype=jnp.float32)
    flags = np.zeros((batch, num_nodes, 3), dtype=np.float32)
    for bi in range(batch):
        flags[bi, 0, 0] = 1.0              # node 0 is the player
        flags[bi, 1, 1] = 1.0              # node 1 is the ball
        flags[bi, 2:2 + 3 + bi, 2] = 1.0   # a few bricks (count varies per batch)
    x = jnp.concatenate([core, jnp.asarray(flags)], axis=-1)   # (B, N, 8)

    # Deterministic Glorot-style weights.
    w1 = (jax.random.normal(k_w1, (5, hidden_dim), dtype=jnp.float32)
          * (1.0 / np.sqrt(5.0)))
    b1 = jnp.zeros((hidden_dim,), dtype=jnp.float32)
    w2 = (jax.random.normal(k_w2, (hidden_dim, output_dim), dtype=jnp.float32)
          * (1.0 / np.sqrt(hidden_dim)))
    b2 = jnp.zeros((output_dim,), dtype=jnp.float32)

    out = jax.block_until_ready(gnn_forward(x, w1, b1, w2, b2))
    ref = jax.block_until_ready(gnn_reference(x, w1, b1, w2, b2))

    assert out.shape == (batch, output_dim)
    np.testing.assert_allclose(np.asarray(out), np.asarray(ref),
                               rtol=1e-5, atol=1e-5)
    print("KERNEL_OK")
</pallas_src>

<mosaic_0001>
module attributes {stable_mosaic.version = 11 : i64} {
  func.func @_gnn_kernel(%arg0: i32, %arg1: memref<2x8x8xf32, #tpu.memory_space<vmem>>, %arg2: memref<5x32xf32, #tpu.memory_space<vmem>>, %arg3: memref<1x32xf32, #tpu.memory_space<vmem>>, %arg4: memref<32x16xf32, #tpu.memory_space<vmem>>, %arg5: memref<1x16xf32, #tpu.memory_space<vmem>>, %arg6: memref<2x16xf32, #tpu.memory_space<vmem>>) attributes {dimension_semantics = [#tpu.dimension_semantics<parallel>], iteration_bounds = array<i64: 1>, scalar_prefetch = 0 : i64, scratch_operands = 0 : i64, tpu.core_type = #tpu.core_type<tc>, window_params = [{transform_indices = @transform_0, window_bounds = array<i64: 2, 8, 8>}, {pipeline_mode = #tpu.pipeline_mode<synchronous>, transform_indices = @transform_1, window_bounds = array<i64: 5, 32>}, {pipeline_mode = #tpu.pipeline_mode<synchronous>, transform_indices = @transform_2, window_bounds = array<i64: 1, 32>}, {pipeline_mode = #tpu.pipeline_mode<synchronous>, transform_indices = @transform_3, window_bounds = array<i64: 32, 16>}, {pipeline_mode = #tpu.pipeline_mode<synchronous>, transform_indices = @transform_4, window_bounds = array<i64: 1, 16>}, {transform_indices = @transform_5, window_bounds = array<i64: 2, 16>}]} {
    %c0 = arith.constant 0 : index
    %c0_0 = arith.constant 0 : index
    %c0_1 = arith.constant 0 : index
    %0 = vector.load %arg1[%c0, %c0_0, %c0_1] : memref<2x8x8xf32, #tpu.memory_space<vmem>>, vector<2x8x8xf32>
    %1 = vector.extract_strided_slice %0 {offsets = [0, 0, 0], sizes = [2, 8, 5], strides = [1, 1, 1]} : vector<2x8x8xf32> to vector<2x8x5xf32>
    %2 = vector.extract_strided_slice %0 {offsets = [0, 0, 5], sizes = [2, 8, 1], strides = [1, 1, 1]} : vector<2x8x8xf32> to vector<2x8x1xf32>
    %cst = arith.constant 1.000000e+00 : f32
    %3 = vector.broadcast %cst : f32 to vector<2x8x1xf32>
    %4 = arith.cmpf oeq, %2, %3 : vector<2x8x1xf32>
    %5 = arith.extui %4 : vector<2x8x1xi1> to vector<2x8x1xi32>
    %6 = arith.sitofp %5 : vector<2x8x1xi32> to vector<2x8x1xf32>
    %7 = vector.extract_strided_slice %0 {offsets = [0, 0, 6], sizes = [2, 8, 1], strides = [1, 1, 1]} : vector<2x8x8xf32> to vector<2x8x1xf32>
    %cst_2 = arith.constant 1.000000e+00 : f32
    %8 = vector.broadcast %cst_2 : f32 to vector<2x8x1xf32>
    %9 = arith.cmpf oeq, %7, %8 : vector<2x8x1xf32>
    %10 = arith.extui %9 : vector<2x8x1xi1> to vector<2x8x1xi32>
    %11 = arith.sitofp %10 : vector<2x8x1xi32> to vector<2x8x1xf32>
    %12 = vector.extract_strided_slice %0 {offsets = [0, 0, 7], sizes = [2, 8, 1], strides = [1, 1, 1]} : vector<2x8x8xf32> to vector<2x8x1xf32>
    %cst_3 = arith.constant 1.000000e+00 : f32
    %13 = vector.broadcast %cst_3 : f32 to vector<2x8x1xf32>
    %14 = arith.cmpf oeq, %12, %13 : vector<2x8x1xf32>
    %15 = arith.extui %14 : vector<2x8x1xi1> to vector<2x8x1xi32>
    %16 = arith.sitofp %15 : vector<2x8x1xi32> to vector<2x8x1xf32>
    %cst_4 = arith.constant dense<0.000000e+00> : vector<2x1xf32>
    %17 = vector.multi_reduction <add>, %16, %cst_4 [1] : vector<2x8x1xf32> to vector<2x1xf32>
    %18 = vector.shape_cast %17 : vector<2x1xf32> to vector<2x1x1xf32>
    %cst_5 = arith.constant 1.000000e+00 : f32
    %19 = vector.broadcast %cst_5 : f32 to vector<2x1x1xf32>
    %20 = arith.addf %19, %18 : vector<2x1x1xf32>
    %21 = vector.broadcast %20 : vector<2x1x1xf32> to vector<2x8x1xf32>
    %22 = arith.mulf %11, %21 : vector<2x8x1xf32>
    %cst_6 = arith.constant 1.000000e+00 : f32
    %23 = vector.broadcast %cst_6 : f32 to vector<2x8x1xf32>
    %24 = arith.addf %23, %22 : vector<2x8x1xf32>
    %25 = arith.addf %24, %6 : vector<2x8x1xf32>
    %26 = arith.addf %25, %16 : vector<2x8x1xf32>
    %27 = math.sqrt %26 : vector<2x8x1xf32>
    %cst_7 = arith.constant 1.000000e+00 : f32
    %28 = vector.broadcast %cst_7 : f32 to vector<2x8x1xf32>
    %29 = arith.divf %28, %27 : vector<2x8x1xf32>
    %c0_8 = arith.constant 0 : index
    %c0_9 = arith.constant 0 : index
    %30 = vector.load %arg2[%c0_8, %c0_9] : memref<5x32xf32, #tpu.memory_space<vmem>>, vector<5x32xf32>
    %31 = vector.extract_strided_slice %1 {offsets = [0, 0, 0], sizes = [2, 8, 1], strides = [1, 1, 1]} : vector<2x8x5xf32> to vector<2x8x1xf32>
    %32 = vector.extract_strided_slice %30 {offsets = [0, 0], sizes = [1, 32], strides = [1, 1]} : vector<5x32xf32> to vector<1x32xf32>
    %33 = vector.shape_cast %32 : vector<1x32xf32> to vector<32xf32>
    %34 = vector.shape_cast %33 : vector<32xf32> to vector<1x1x32xf32>
    %35 = vector.broadcast %31 : vector<2x8x1xf32> to vector<2x8x32xf32>
    %36 = vector.broadcast %34 : vector<1x1x32xf32> to vector<2x8x32xf32>
    %37 = arith.mulf %35, %36 : vector<2x8x32xf32>
    %38 = vector.extract_strided_slice %1 {offsets = [0, 0, 1], sizes = [2, 8, 1], strides = [1, 1, 1]} : vector<2x8x5xf32> to vector<2x8x1xf32>
    %39 = vector.extract_strided_slice %30 {offsets = [1, 0], sizes = [1, 32], strides = [1, 1]} : vector<5x32xf32> to vector<1x32xf32>
    %40 = vector.shape_cast %39 : vector<1x32xf32> to vector<32xf32>
    %41 = vector.shape_cast %40 : vector<32xf32> to vector<1x1x32xf32>
    %42 = vector.broadcast %38 : vector<2x8x1xf32> to vector<2x8x32xf32>
    %43 = vector.broadcast %41 : vector<1x1x32xf32> to vector<2x8x32xf32>
    %44 = arith.mulf %42, %43 : vector<2x8x32xf32>
    %45 = arith.addf %37, %44 : vector<2x8x32xf32>
    %46 = vector.extract_strided_slice %1 {offsets = [0, 0, 2], sizes = [2, 8, 1], strides = [1, 1, 1]} : vector<2x8x5xf32> to vector<2x8x1xf32>
    %47 = vector.extract_strided_slice %30 {offsets = [2, 0], sizes = [1, 32], strides = [1, 1]} : vector<5x32xf32> to vector<1x32xf32>
    %48 = vector.shape_cast %47 : vector<1x32xf32> to vector<32xf32>
    %49 = vector.shape_cast %48 : vector<32xf32> to vector<1x1x32xf32>
    %50 = vector.broadcast %46 : vector<2x8x1xf32> to vector<2x8x32xf32>
    %51 = vector.broadcast %49 : vector<1x1x32xf32> to vector<2x8x32xf32>
    %52 = arith.mulf %50, %51 : vector<2x8x32xf32>
    %53 = arith.addf %45, %52 : vector<2x8x32xf32>
    %54 = vector.extract_strided_slice %1 {offsets = [0, 0, 3], sizes = [2, 8, 1], strides = [1, 1, 1]} : vector<2x8x5xf32> to vector<2x8x1xf32>
    %55 = vector.extract_strided_slice %30 {offsets = [3, 0], sizes = [1, 32], strides = [1, 1]} : vector<5x32xf32> to vector<1x32xf32>
    %56 = vector.shape_cast %55 : vector<1x32xf32> to vector<32xf32>
    %57 = vector.shape_cast %56 : vector<32xf32> to vector<1x1x32xf32>
    %58 = vector.broadcast %54 : vector<2x8x1xf32> to vector<2x8x32xf32>
    %59 = vector.broadcast %57 : vector<1x1x32xf32> to vector<2x8x32xf32>
    %60 = arith.mulf %58, %59 : vector<2x8x32xf32>
    %61 = arith.addf %53, %60 : vector<2x8x32xf32>
    %62 = vector.extract_strided_slice %1 {offsets = [0, 0, 4], sizes = [2, 8, 1], strides = [1, 1, 1]} : vector<2x8x5xf32> to vector<2x8x1xf32>
    %63 = vector.extract_strided_slice %30 {offsets = [4, 0], sizes = [1, 32], strides = [1, 1]} : vector<5x32xf32> to vector<1x32xf32>
    %64 = vector.shape_cast %63 : vector<1x32xf32> to vector<32xf32>
    %65 = vector.shape_cast %64 : vector<32xf32> to vector<1x1x32xf32>
    %66 = vector.broadcast %62 : vector<2x8x1xf32> to vector<2x8x32xf32>
    %67 = vector.broadcast %65 : vector<1x1x32xf32> to vector<2x8x32xf32>
    %68 = arith.mulf %66, %67 : vector<2x8x32xf32>
    %69 = arith.addf %61, %68 : vector<2x8x32xf32>
    %70 = vector.broadcast %29 : vector<2x8x1xf32> to vector<2x8x32xf32>
    %71 = arith.mulf %70, %69 : vector<2x8x32xf32>
    %72 = vector.broadcast %11 : vector<2x8x1xf32> to vector<2x8x32xf32>
    %73 = arith.mulf %72, %71 : vector<2x8x32xf32>
    %cst_10 = arith.constant dense<0.000000e+00> : vector<2x32xf32>
    %74 = vector.multi_reduction <add>, %73, %cst_10 [1] : vector<2x8x32xf32> to vector<2x32xf32>
    %75 = vector.shape_cast %74 : vector<2x32xf32> to vector<2x1x32xf32>
    %76 = vector.broadcast %6 : vector<2x8x1xf32> to vector<2x8x32xf32>
    %77 = arith.mulf %76, %71 : vector<2x8x32xf32>
    %cst_11 = arith.constant dense<0.000000e+00> : vector<2x32xf32>
    %78 = vector.multi_reduction <add>, %77, %cst_11 [1] : vector<2x8x32xf32> to vector<2x32xf32>
    %79 = vector.shape_cast %78 : vector<2x32xf32> to vector<2x1x32xf32>
    %80 = vector.broadcast %16 : vector<2x8x1xf32> to vector<2x8x32xf32>
    %81 = arith.mulf %80, %71 : vector<2x8x32xf32>
    %cst_12 = arith.constant dense<0.000000e+00> : vector<2x32xf32>
    %82 = vector.multi_reduction <add>, %81, %cst_12 [1] : vector<2x8x32xf32> to vector<2x32xf32>
    %83 = vector.shape_cast %82 : vector<2x32xf32> to vector<2x1x32xf32>
    %84 = arith.addf %79, %83 : vector<2x1x32xf32>
    %85 = vector.broadcast %11 : vector<2x8x1xf32> to vector<2x8x32xf32>
    %86 = vector.broadcast %84 : vector<2x1x32xf32> to vector<2x8x32xf32>
    %87 = arith.mulf %85, %86 : vector<2x8x32xf32>
    %88 = arith.addf %6, %16 : vector<2x8x1xf32>
    %89 = vector.broadcast %88 : vector<2x8x1xf32> to vector<2x8x32xf32>
    %90 = vector.broadcast %75 : vector<2x1x32xf32> to vector<2x8x32xf32>
    %91 = arith.mulf %89, %90 : vector<2x8x32xf32>
    %92 = arith.addf %87, %91 : vector<2x8x32xf32>
    %93 = arith.addf %71, %92 : vector<2x8x32xf32>
    %94 = vector.broadcast %29 : vector<2x8x1xf32> to vector<2x8x32xf32>
    %95 = arith.mulf %94, %93 : vector<2x8x32xf32>
    %c0_13 = arith.constant 0 : index
    %c0_14 = arith.constant 0 : index
    %96 = vector.load %arg3[%c0_13, %c0_14] : memref<1x32xf32, #tpu.memory_space<vmem>>, vector<1x32xf32>
    %97 = vector.shape_cast %96 : vector<1x32xf32> to vector<1x1x32xf32>
    %98 = vector.broadcast %97 : vector<1x1x32xf32> to vector<2x8x32xf32>
    %99 = arith.addf %95, %98 : vector<2x8x32xf32>
    %cst_15 = arith.constant 0.000000e+00 : f32
    %100 = vector.broadcast %cst_15 : f32 to vector<2x8x32xf32>
    %101 = arith.maximumf %99, %100 : vector<2x8x32xf32>
    %102 = arith.mulf %11, %29 : vector<2x8x1xf32>
    %cst_16 = arith.constant dense<0.000000e+00> : vector<2x1xf32>
    %103 = vector.multi_reduction <add>, %102, %cst_16 [1] : vector<2x8x1xf32> to vector<2x1xf32>
    %104 = vector.shape_cast %103 : vector<2x1xf32> to vector<2x1x1xf32>
    %105 = arith.mulf %6, %29 : vector<2x8x1xf32>
    %cst_17 = arith.constant dense<0.000000e+00> : vector<2x1xf32>
    %106 = vector.multi_reduction <add>, %105, %cst_17 [1] : vector<2x8x1xf32> to vector<2x1xf32>
    %107 = vector.shape_cast %106 : vector<2x1xf32> to vector<2x1x1xf32>
    %108 = arith.mulf %16, %29 : vector<2x8x1xf32>
    %cst_18 = arith.constant dense<0.000000e+00> : vector<2x1xf32>
    %109 = vector.multi_reduction <add>, %108, %cst_18 [1] : vector<2x8x1xf32> to vector<2x1xf32>
    %110 = vector.shape_cast %109 : vector<2x1xf32> to vector<2x1x1xf32>
    %111 = arith.addf %107, %110 : vector<2x1x1xf32>
    %112 = vector.broadcast %111 : vector<2x1x1xf32> to vector<2x8x1xf32>
    %113 = arith.mulf %11, %112 : vector<2x8x1xf32>
    %114 = arith.addf %6, %16 : vector<2x8x1xf32>
    %115 = vector.broadcast %104 : vector<2x1x1xf32> to vector<2x8x1xf32>
    %116 = arith.mulf %114, %115 : vector<2x8x1xf32>
    %117 = arith.addf %113, %116 : vector<2x8x1xf32>
    %118 = arith.addf %29, %117 : vector<2x8x1xf32>
    %119 = arith.mulf %29, %118 : vector<2x8x1xf32>
    %120 = vector.broadcast %119 : vector<2x8x1xf32> to vector<2x8x32xf32>
    %121 = arith.mulf %120, %101 : vector<2x8x32xf32>
    %cst_19 = arith.constant dense<0.000000e+00> : vector<2x32xf32>
    %122 = vector.multi_reduction <add>, %121, %cst_19 [1] : vector<2x8x32xf32> to vector<2x32xf32>
    %cst_20 = arith.constant 1.250000e-01 : f32
    %123 = vector.broadcast %cst_20 : f32 to vector<2x32xf32>
    %124 = arith.mulf %122, %123 : vector<2x32xf32>
    %c0_21 = arith.constant 0 : index
    %c0_22 = arith.constant 0 : index
    %125 = vector.load %arg4[%c0_21, %c0_22] : memref<32x16xf32, #tpu.memory_space<vmem>>, vector<32x16xf32>
    %cst_23 = arith.constant dense<0.000000e+00> : vector<2x16xf32>
    %126 = tpu.matmul %124, %125, %cst_23 {dimension_numbers = #tpu.dot_dimension_numbers<[1], [0], [0], [1], [0, 0, 1, 1], [], []>} : vector<2x32xf32>, vector<32x16xf32>, vector<2x16xf32> -> vector<2x16xf32>
    %c0_24 = arith.constant 0 : index
    %c0_25 = arith.constant 0 : index
    %127 = vector.load %arg5[%c0_24, %c0_25] : memref<1x16xf32, #tpu.memory_space<vmem>>, vector<1x16xf32>
    %128 = vector.broadcast %127 : vector<1x16xf32> to vector<2x16xf32>
    %129 = arith.addf %126, %128 : vector<2x16xf32>
    %c0_26 = arith.constant 0 : index
    %c0_27 = arith.constant 0 : index
    %130 = vector.load %arg6[%c0_26, %c0_27] : memref<2x16xf32, #tpu.memory_space<vmem>>, vector<2x16xf32>
    tpu.vector_store %arg6[%c0_26, %c0_27], %129 {strides = array<i32>} : memref<2x16xf32, #tpu.memory_space<vmem>>, vector<2x16xf32>,
    return
  }
  func.func @transform_0(%arg0: i32) -> (i32, i32, i32) {
    %c0_i32 = arith.constant 0 : i32
    %c0_i32_0 = arith.constant 0 : i32
    %c0_i32_1 = arith.constant 0 : i32
    return %arg0, %c0_i32, %c0_i32_0 : i32, i32, i32
  }
  func.func @transform_1(%arg0: i32) -> (i32, i32) {
    %c0_i32 = arith.constant 0 : i32
    %c0_i32_0 = arith.constant 0 : i32
    %c0_i32_1 = arith.constant 0 : i32
    return %c0_i32, %c0_i32_0 : i32, i32
  }
  func.func @transform_2(%arg0: i32) -> (i32, i32) {
    %c0_i32 = arith.constant 0 : i32
    %c0_i32_0 = arith.constant 0 : i32
    %c0_i32_1 = arith.constant 0 : i32
    return %c0_i32, %c0_i32_0 : i32, i32
  }
  func.func @transform_3(%arg0: i32) -> (i32, i32) {
    %c0_i32 = arith.constant 0 : i32
    %c0_i32_0 = arith.constant 0 : i32
    %c0_i32_1 = arith.constant 0 : i32
    return %c0_i32, %c0_i32_0 : i32, i32
  }
  func.func @transform_4(%arg0: i32) -> (i32, i32) {
    %c0_i32 = arith.constant 0 : i32
    %c0_i32_0 = arith.constant 0 : i32
    %c0_i32_1 = arith.constant 0 : i32
    return %c0_i32, %c0_i32_0 : i32, i32
  }
  func.func @transform_5(%arg0: i32) -> (i32, i32) {
    %c0_i32 = arith.constant 0 : i32
    %c0_i32_0 = arith.constant 0 : i32
    return %arg0, %c0_i32 : i32, i32
  }
}

</mosaic_0001>

<bundles_post_ra>
// kernel: tpu_custom_call.1
= control target key start
LH: loop header
LB: loop body
LE: loop exit
PB: predicated region body
PF: predicated region fallthrough
CT: control target
= control target key end

     0   :  { %vm29_vm0 = vcmask 64568   ;;  %s880_s0 = inlined_call_operand.vmem [shape: f32[2,8,8], index: 0, kind: input, shape index: {}]   ;;  %s881_s1 = inlined_call_operand.vmem [shape: f32[5,32], index: 1, kind: input, shape index: {}]   ;;  %s882_s2 = inlined_call_operand.vmem [shape: f32[1,32], index: 2, kind: input, shape index: {}]   ;;  %s883_s3 = inlined_call_operand.vmem [shape: f32[32,16], index: 3, kind: input, shape index: {}]   ;;  %s884_s4 = inlined_call_operand.vmem [shape: f32[1,16], index: 4, kind: input, shape index: {}]   ;;  %s885_s5 = inlined_call_operand.hbm [shape: f32[2,16], index: 5, kind: output, shape index: {}]  }
   0x1   :  { %v721_v0 = vld [vmem:[%s880_s0] sm:$0xff]  ;;  %v726_v1 = vld [vmem:[%s880_s0 + $0x8] sm:$0xff] }
   0x2   :  { %vm23_vm1 = vcmp.eq.f32.partialorder %v721_v0, 1.0  ;;  %vm24_vm2 = vcmp.eq.f32.partialorder %v726_v1, 1.0 }
   0x3   :  { %10 = vsyncpa [#allocation3], 0  ;;  %v673_v2 = vmov 0.0   ;;  %s674_s0 = smov 1   ;;  %s675_s22 = smov 127   ;;  %vm303_vm7 = vcmask 56368  }
   0x4   :  { %v731_v3 = vsel %vm23_vm1, 1.0, %v673_v2  ;;  %v734_v4 = vsel %vm24_vm2, 1.0, %v673_v2  ;;  %s676_s23 = smov 126   ;;  %vm326_vm8 = vcmask 48168   ;;  %vm686_vm9 = vmmov 0   ;;  %s687_s10 = smov [#allocation2]  }
   0x5   :  { %v738_v5 = vpack.i.bf16 %v734_v4, %v731_v3  ;;  %v30_v6 = vsel %vm29_vm0, %v731_v3, 0.0  ;;  %v37_v7 = vsel %vm29_vm0, %v734_v4, 0.0  ;;  %564 = vmatprep.mubr.msk.f32.mxu0 %vm686_vm9, %v673_v2  ;;  %vm197_vm10 = vcmask 261120   ;;  %s538_s11 = sshll.u32 %s687_s10, 4  ;;  %s539_s11 = int_to_ptr.vmem [resolvable:$true] %s538_s11 }
   0x6   :  { %v31_v8 = vrot.slane %v30_v6, 4  ;;  %v38_v9 = vrot.slane %v37_v7, 4  ;;  %vm456_vm11 = vcmask 1041409   ;;  %vm530_vm12 = vcmask 123904   ;;  %s649_s12 = scalar_lea.vmem %s539_s11, 32  ;;  %p654_p1 = scmp.lt.s32.totalorder %s539_s11, %s539_s11 }
   0x7   :  { %589 = vrot.lane.b32.xlu1 %v738_v5, %s674_s0  ;;  %p650_p0 = scmp.ne.s32.totalorder %s539_s11, %s649_s12  ;;  %p655_p2 = scmp.lt.s32.totalorder %s649_s12, %s649_s12 }
   0x8   :  { %v32_v10 = vadd.f32 %v31_v8, %v30_v6  ;;  %v39_v11 = vadd.f32 %v38_v9, %v37_v7 }
   0x9   :  { %p656_p3 = por %p655_p2, %p654_p1 }
   0xa   :  { %v33_v12 = vrot.slane %v32_v10, 2  ;;  %v40_v13 = vrot.slane %v39_v11, 2 }
   0xb   :  { %594 = vrot.lane.b32.xlu1 %v738_v5, %s675_s22  ;;  %p657_p4 = pnand %p656_p3, %p650_p0 }
   0xc   :  { %v34_v14 = vadd.f32 %v33_v12, %v32_v10  ;;  %v41_v15 = vadd.f32 %v40_v13, %v39_v11 }
   0xe   :  { %v35_v16 = vrot.slane %v34_v14, 1  ;;  %v42_v17 = vrot.slane %v41_v15, 1 }
  0x10   :  { %v36_v18 = vadd.f32 %v35_v16, %v34_v14  ;;  %v43_v19 = vadd.f32 %v42_v17, %v41_v15 }
  0x12   :  { %v44_v20 = vadd.f32 1.0, %v36_v18  ;;  %v45_v21 = vadd.f32 1.0, %v43_v19 }
  0x14   :  { %48 = vrot.lane.b32.xlu0 %v44_v20, %s675_s22 }
  0x18   :  { %50 = vrot.lane.b32.xlu0 %v45_v21, %s675_s22  ;;  %v677_v21 = vmov 0  }
  0x19   :  { %604 = vset.pattern.permute.xlu0 %v677_v21  ;;  %603 = vset.pattern.permute.xlu1 %v677_v21 }
  0x79   :  { %v590_v22 = vpop.permute.xlu1 %589 }
  0x7d   :  { %v595_v24 = vpop.permute.xlu1 %594 }
  0x86   :  { %v49_v23 = vpop.permute.xlu0 %48 }
  0x87   :  { %v54_v25 = vmul.f32 %v731_v3, %v49_v23 }
  0x89   :  { %v56_v26 = vadd.f32 1.0, %v54_v25 }
  0x8a   :  { %v51_v27 = vpop.permute.xlu0 %50 }
  0x8b   :  { %v643_v28 = vadd.low.f32.bf16 %v56_v26, %v590_v22  ;;  %v55_v29 = vmul.f32 %v734_v4, %v51_v27 }
  0x8d   :  { %v644_v30 = vadd.low.f32.bf16 %v643_v28, %v595_v24  ;;  %v57_v31 = vadd.f32 1.0, %v55_v29 }
  0x8f   :  { %635 = vrsqrt.f32 %v644_v30  ;;  %v645_v32 = vadd.high.f32.bf16 %v57_v31, %v590_v22  ;;  %vm78_vm3 = vcmp.eq.f32.partialorder %v644_v30, inf  ;;  %v81_v36 = vand.u32 2147483648, %v644_v30 }
  0x90   :  { %vm80_vm4 = vcmp.eq.f32.partialorder %v644_v30, 0.0 }
  0x91   :  { %v646_v33 = vadd.high.f32.bf16 %v645_v32, %v595_v24 }
  0x93   :  { %637 = vrsqrt.f32 %v646_v33  ;;  %vm85_vm5 = vcmp.eq.f32.partialorder %v646_v33, inf  ;;  %v88_v41 = vand.u32 2147483648, %v646_v33  ;;  %vm87_vm6 = vcmp.eq.f32.partialorder %v646_v33, 0.0 }
  0x99   :  { %v636_v34 = vpop.eup %635 }
  0x9a   :  { %v77_v35 = vmul.f32 %v644_v30, %v636_v34 }
  0x9c   :  { %v79_v37 = vsel %vm78_vm3, %v644_v30, %v77_v35 }
  0x9d   :  { %v82_v38 = vsel %vm80_vm4, %v81_v36, %v79_v37  ;;  %v638_v39 = vpop.eup %637  ;;  %v105_v37 = vlaneseq }
  0x9e   :  { %639 = vrcp.f32 %v82_v38  ;;  %v84_v40 = vmul.f32 %v646_v33, %v638_v39 }
  0xa0   :  { %v86_v42 = vsel %vm85_vm5, %v646_v33, %v84_v40  ;;  %v780_v40 = vshrl.u32 %v105_v37, 7 }
  0xa1   :  { %v89_v43 = vsel %vm87_vm6, %v88_v41, %v86_v42 }
  0xa2   :  { %641 = vrcp.f32 %v89_v43  ;;  %v153_v2 = vsub.s32 3, %v780_v40 }
  0xa8   :  { %v752_v44 = vpop.eup %639 }
  0xa9   :  { %341 = vrot.lane.b32.xlu0 %v752_v44, %s674_s0  ;;  %v301_v48 = vmul.f32 %v752_v44, %v731_v3 }
  0xab   :  { %v304_v51 = vsel %vm303_vm7, %v301_v48, 0.0 }
  0xac   :  { %v756_v45 = vpop.eup %641  ;;  %v305_v55 = vrot.slane %v304_v51, 4 }
  0xad   :  { %318 = vrot.lane.b32.xlu0 %v752_v44, %s675_s22  ;;  %343 = vrot.lane.b32.xlu1 %v756_v45, %s674_s0  ;;  %v302_v46 = vmul.f32 %v756_v45, %v734_v4 }
  0xae   :  { %v306_v61 = vadd.f32 %v305_v55, %v304_v51 }
  0xaf   :  { %v311_v47 = vsel %vm303_vm7, %v302_v46, 0.0 }
  0xb0   :  { %v312_v49 = vrot.slane %v311_v47, 4  ;;  %v307_v10 = vrot.slane %v306_v61, 2 }
  0xb1   :  { %599 = vrot.lane.b32.xlu0 %v738_v5, %s676_s23  ;;  %320 = vrot.lane.b32.xlu1 %v756_v45, %s675_s22 }
  0xb2   :  { %v313_v53 = vadd.f32 %v312_v49, %v311_v47  ;;  %v308_v16 = vadd.f32 %v307_v10, %v306_v61  ;;  %v783_v47 = vsub.s32 0, %v780_v40  ;;  %v680_v61 = vmov 3  }
  0xb4   :  { %v314_v60 = vrot.slane %v313_v53, 2  ;;  %v309_v20 = vrot.slane %v308_v16, 1 }
  0xb6   :  { %v315_v8 = vadd.f32 %v314_v60, %v313_v53  ;;  %v310_v22 = vadd.f32 %v309_v20, %v308_v16  ;;  %v679_v60 = vmov 1  }
  0xb8   :  { %v316_v14 = vrot.slane %v315_v8, 1 }
  0xba   :  { %v317_v18 = vadd.f32 %v316_v14, %v315_v8 }
 0x11b   :  { %v342_v50 = vpop.permute.xlu0 %341 }
 0x11c   :  { %v347_v52 = vmul.f32 %v731_v3, %v342_v50 }
 0x11e   :  { %v349_v54 = vsel %vm29_vm0, %v347_v52, 0.0 }
 0x11f   :  { %v350_v56 = vrot.slane %v349_v54, 4  ;;  %v344_v57 = vpop.permute.xlu1 %343  ;;  %v319_v25 = vpop.permute.xlu0 %318 }
 0x120   :  { %v348_v59 = vmul.f32 %v734_v4, %v344_v57  ;;  %v324_v26 = vmul.f32 %v731_v3, %v319_v25  ;;  %v121_v25 = vsub.s32 1, %v780_v40 }
 0x121   :  { %v351_v58 = vadd.f32 %v350_v56, %v349_v54 }
 0x122   :  { %v356_v63 = vsel %vm29_vm0, %v348_v59, 0.0  ;;  %v327_v29 = vsel %vm326_vm8, %v324_v26, 0.0  ;;  %v678_v59 = vmov 2   ;;  %v94_v26 = vld [vmem:[%s881_s1] sm:$0x1f] }
 0x123   :  { %v352_v62 = vrot.slane %v351_v58, 2  ;;  %v357_v6 = vrot.slane %v356_v63, 4  ;;  %v321_v23 = vpop.permute.xlu1 %320  ;;  %v328_v30 = vrot.slane %v327_v29, 4  ;;  %v600_v36 = vpop.permute.xlu0 %599  ;;  %v154_v37 = vrot.slane %v94_v26, %v153_v2 }
 0x124   :  { %v325_v24 = vmul.f32 %v734_v4, %v321_v23  ;;  %v647_v49 = vadd.low.f32.bf16 %v731_v3, %v600_v36  ;;  %v648_v52 = vadd.high.f32.bf16 %v734_v4, %v600_v36 }
 0x125   :  { %v353_v7 = vadd.f32 %v352_v62, %v351_v58  ;;  %v358_v9 = vadd.f32 %v357_v6, %v356_v63  ;;  %v329_v32 = vadd.f32 %v328_v30, %v327_v29  ;;  %v681_v62 = vmov 6  }
 0x126   :  { %v334_v27 = vsel %vm326_vm8, %v325_v24, 0.0  ;;  %v682_v63 = vmov 7   ;;  %v683_v6 = vmov 5   ;;  %v137_v29 = vsub.s32 2, %v780_v40 }
 0x127   :  { %v354_v11 = vrot.slane %v353_v7, 1  ;;  %v359_v12 = vrot.slane %v358_v9, 2  ;;  %v335_v28 = vrot.slane %v334_v27, 4  ;;  %v330_v34 = vrot.slane %v329_v32, 2 }
 0x128   :  { %v122_v30 = vrot.slane %v94_v26, %v121_v25 }
 0x129   :  { %v355_v13 = vadd.f32 %v354_v11, %v353_v7  ;;  %v360_v15 = vadd.f32 %v359_v12, %v358_v9  ;;  %v336_v31 = vadd.f32 %v335_v28, %v334_v27  ;;  %v331_v38 = vadd.f32 %v330_v34, %v329_v32 }
 0x12a   :  { %v684_v7 = vmov 4   ;;  %v108_v28 = vrot.slane %v94_v26, %v783_v47  ;;  %v138_v34 = vrot.slane %v94_v26, %v137_v29 }
 0x12b   :  { %365 = vrot.lane.b32.xlu0 %v355_v13, %s676_s23  ;;  %v361_v17 = vrot.slane %v360_v15, 1  ;;  %v337_v33 = vrot.slane %v336_v31, 2  ;;  %v332_v42 = vrot.slane %v331_v38, 1 }
 0x12d   :  { %v362_v19 = vadd.f32 %v361_v17, %v360_v15  ;;  %v338_v35 = vadd.f32 %v337_v33, %v336_v31  ;;  %v333_v50 = vadd.f32 %v332_v42, %v331_v38  ;;  %v443_v17 = vld [vmem:[%s883_s3] sm:$0xff]  ;;  %v169_v38 = vsub.s32 4, %v780_v40 }
 0x12f   :  { %395 = vrot.lane.b32.xlu0 %v317_v18, %s675_s22  ;;  %367 = vrot.lane.b32.xlu1 %v362_v19, %s676_s23  ;;  %v339_v39 = vrot.slane %v338_v35, 1  ;;  %v685_v19 = vmov 0.0|0.0  }
 0x130   :  { %567 = vmatprep.subr.bf16.mxu0 %v685_v19 }
 0x131   :  { %v340_v43 = vadd.f32 %v339_v39, %v338_v35 }
 0x133   :  { %393 = vrot.lane.b32.xlu1 %v310_v22, %s675_s22 }
 0x19d   :  { %v366_v41 = vpop.permute.xlu0 %365 }
 0x19e   :  { %v371_v55 = vadd.f32 %v366_v41, %v333_v50 }
 0x1a0   :  { %v376_v58 = vrot.slane %v371_v55, %v783_v47 }
 0x1a1   :  { %v368_v46 = vpop.permute.xlu1 %367  ;;  %v396_v53 = vpop.permute.xlu0 %395 }
 0x1a2   :  { %v372_v48 = vadd.f32 %v368_v46, %v340_v43  ;;  %v400_v57 = vmul.f32 %v648_v52, %v396_v53 }
 0x1a4   :  { %v380_v51 = vrot.slane %v372_v48, %v783_v47  ;;  %v170_v47 = vrot.slane %v94_v26, %v169_v38 }
 0x1a5   :  { %v394_v54 = vpop.permute.xlu1 %393 }
 0x1a6   :  { %v399_v56 = vmul.f32 %v647_v49, %v394_v54  ;;  %385 = vrot.lane.b32.xlu0 %v380_v51, %s674_s0 }
 0x1a8   :  { %403 = vrot.lane.b32.xlu1 %v399_v56, %s674_s0 }
 0x1aa   :  { %405 = vrot.lane.b32.xlu0 %v400_v57, %s674_s0 }
 0x1ac   :  { %383 = vrot.lane.b32.xlu1 %v376_v58, %s674_s0 }
 0x1ae   :  { %102 = vperm.xlu0 %604, %v726_v1  }
 0x1b0   :  { %97 = vperm.xlu1 %603, %v721_v0  }
 0x1b2   :  { %606 = vset.pattern.permute.xlu0 %v678_v59 }
 0x1b3   :  { %128 = vperm.xlu0 %606, %v721_v0  }
 0x1b4   :  { %605 = vset.pattern.permute.xlu1 %v679_v60 }
 0x1b5   :  { %112 = vperm.xlu1 %605, %v721_v0  }
 0x1b7   :  { %609 = vset.pattern.permute.xlu0 %v680_v61 }
 0x1b8   :  { %148 = vperm.xlu0 %609, %v726_v1  }
 0x1b9   :  { %116 = vperm.xlu1 %605, %v726_v1  }
 0x1bc   :  { %611 = vset.pattern.permute.xlu0 %v681_v62 }
 0x1bd   :  { %177 = vperm.xlu0 %611, %v752_v44   ;;  %607 = vset.pattern.permute.xlu1 %v678_v59 }
 0x1be   :  { %132 = vperm.xlu1 %607, %v726_v1  }
 0x1c1   :  { %619 = vset.pattern.permute.xlu0 %v682_v63 }
 0x1c2   :  { %621 = vperm.xlu0 %619, %v738_v5   ;;  %608 = vset.pattern.permute.xlu1 %v680_v61 }
 0x1c3   :  { %144 = vperm.xlu1 %608, %v721_v0  }
 0x1c6   :  { %632 = vset.pattern.permute.xlu0 %v683_v6 }
 0x1c7   :  { %279 = vperm.xlu0 %632, %v648_v52   ;;  %610 = vset.pattern.permute.xlu1 %v684_v7 }
 0x1c8   :  { %160 = vperm.xlu1 %610, %v721_v0  }
 0x1cb   :  { %634 = vset.pattern.permute.xlu0 %v681_v62 }
 0x1cc   :  { %164 = vperm.xlu1 %610, %v726_v1  }
 0x1d0   :  { %612 = vset.pattern.permute.xlu1 %v681_v62 }
 0x1d1   :  { %182 = vperm.xlu1 %612, %v756_v45  }
 0x1d5   :  { %613 = vset.pattern.permute.xlu1 %v683_v6 }
 0x1d6   :  { %615 = vperm.xlu1 %613, %v738_v5  }
 0x1da   :  { %625 = vset.pattern.permute.xlu1 %v681_v62 }
 0x1db   :  { %627 = vperm.xlu1 %625, %v738_v5  }
 0x1df   :  { %631 = vset.pattern.permute.xlu1 %v683_v6 }
 0x1e0   :  { %274 = vperm.xlu1 %631, %v647_v49  }
 0x1e4   :  { %633 = vset.pattern.permute.xlu1 %v681_v62 }
 0x218   :  { %v386_v8 = vpop.permute.xlu0 %385 }
 0x219   :  { %v390_v0 = vmul.f32 %v734_v4, %v386_v8 }
 0x21a   :  { %v404_v9 = vpop.permute.xlu1 %403 }
 0x21c   :  { %v406_v10 = vpop.permute.xlu0 %405 }
 0x21d   :  { %v410_v12 = vadd.f32 %v406_v10, %v390_v0 }
 0x21e   :  { %v384_v11 = vpop.permute.xlu1 %383 }
 0x21f   :  { %v389_v1 = vmul.f32 %v731_v3, %v384_v11  ;;  %v412_v15 = vadd.f32 %v756_v45, %v410_v12  ;;  %v444_v3 = vld [vmem:[%s883_s3 + $0x8] sm:$0xff] }
 0x220   :  { %v568_v18 = vpack.c.bf16 %v444_v3, %v443_v17 }
 0x221   :  { %v409_v13 = vadd.f32 %v404_v9, %v389_v1  ;;  %v414_v5 = vmul.f32 %v756_v45, %v412_v15  ;;  %v446_v45 = vld [vmem:[%s883_s3 + $0x18] sm:$0xff] }
 0x222   :  { %569 = vmatpush3.bf16.msra.mxu0 %v568_v18 }
 0x223   :  { %v411_v14 = vadd.f32 %v752_v44, %v409_v13  ;;  %570 = vmatprep.subr.bf16.mxu0 %v685_v19 }
 0x225   :  { %v413_v16 = vmul.f32 %v752_v44, %v411_v14  ;;  %v445_v44 = vld [vmem:[%s883_s3 + $0x10] sm:$0xff] }
 0x226   :  { %v571_v20 = vpack.c.bf16 %v446_v45, %v445_v44 }
 0x227   :  { %417 = vperm.xlu1 %633, %v413_v16  }
 0x228   :  { %572 = vmatpush3.bf16.msra.mxu0 %v571_v20 }
 0x22b   :  { %422 = vperm.xlu1 %633, %v414_v5  }
 0x22d   :  { %v103_v31 = vpop.permute.xlu0 %102 }
 0x22e   :  { %v110_v39 = vmul.f32 %v108_v28, %v103_v31 }
 0x22f   :  { %v98_v4 = vpop.permute.xlu1 %97 }
 0x230   :  { %v109_v33 = vmul.f32 %v108_v28, %v98_v4 }
 0x232   :  { %v129_v36 = vpop.permute.xlu0 %128 }
 0x233   :  { %v139_v41 = vmul.f32 %v138_v34, %v129_v36 }
 0x234   :  { %v113_v21 = vpop.permute.xlu1 %112 }
 0x235   :  { %v123_v35 = vmul.f32 %v122_v30, %v113_v21 }
 0x237   :  { %v125_v42 = vadd.f32 %v123_v35, %v109_v33  ;;  %v149_v52 = vpop.permute.xlu0 %148 }
 0x238   :  { %v117_v22 = vpop.permute.xlu1 %116  ;;  %v156_v54 = vmul.f32 %v154_v37, %v149_v52 }
 0x239   :  { %v124_v43 = vmul.f32 %v122_v30, %v117_v22  ;;  %v141_v50 = vadd.f32 %v139_v41, %v125_v42 }
 0x23b   :  { %v126_v48 = vadd.f32 %v124_v43, %v110_v39 }
 0x23c   :  { %v837_v58 = vpop.permute.xlu0 %177 }
 0x23d   :  { %v133_v23 = vpop.permute.xlu1 %132 }
 0x23e   :  { %v140_v49 = vmul.f32 %v138_v34, %v133_v23 }
 0x240   :  { %v142_v55 = vadd.f32 %v140_v49, %v126_v48 }
 0x241   :  { %v622_v63 = vpop.permute.xlu0 %621 }
 0x242   :  { %v145_v24 = vpop.permute.xlu1 %144  ;;  %v158_v59 = vadd.f32 %v156_v54, %v142_v55  ;;  %v623_v6 = vunpack.i.l.bf16 %v622_v63  ;;  %v624_v0 = vunpack.i.h.bf16 %v622_v63 }
 0x243   :  { %v155_v51 = vmul.f32 %v154_v37, %v145_v24 }
 0x245   :  { %v157_v56 = vadd.f32 %v155_v51, %v141_v50 }
 0x246   :  { %v280_v63 = vpop.permute.xlu0 %279 }
 0x247   :  { %v161_v27 = vpop.permute.xlu1 %160 }
 0x248   :  { %v171_v57 = vmul.f32 %v170_v47, %v161_v27 }
 0x24a   :  { %v173_v40 = vadd.f32 %v171_v57, %v157_v56 }
 0x24b   :  { %v165_v32 = vpop.permute.xlu1 %164 }
 0x24c   :  { %v172_v60 = vmul.f32 %v170_v47, %v165_v32  ;;  %v842_v7 = vmul.f32 %v837_v58, %v173_v40 }
 0x24e   :  { %v174_v8 = vadd.f32 %v172_v60, %v158_v59  ;;  %v244_v1 = vmul.f32 %v623_v6, %v842_v7 }
 0x250   :  { %v835_v46 = vpop.permute.xlu1 %182  ;;  %v246_v17 = vsel %vm197_vm10, %v244_v1, 0.0 }
 0x251   :  { %v186_v12 = vmul.f32 %v835_v46, %v174_v8  ;;  %v247_v44 = vrot.slane %v246_v17, 4 }
 0x253   :  { %v245_v5 = vmul.f32 %v624_v0, %v186_v12  ;;  %v248_v25 = vadd.f32 %v247_v44, %v246_v17 }
 0x255   :  { %v616_v53 = vpop.permute.xlu1 %615  ;;  %v253_v20 = vsel %vm197_vm10, %v245_v5, 0.0  ;;  %v249_v30 = vrot.slane %v248_v25, 2 }
 0x256   :  { %v617_v62 = vunpack.i.l.bf16 %v616_v53  ;;  %v618_v10 = vunpack.i.h.bf16 %v616_v53  ;;  %v254_v24 = vrot.slane %v253_v20, 4 }
 0x257   :  { %v250_v35 = vadd.f32 %v249_v30, %v248_v25 }
 0x258   :  { %v220_v11 = vmul.f32 %v617_v62, %v842_v7  ;;  %v221_v15 = vmul.f32 %v618_v10, %v186_v12  ;;  %v255_v31 = vadd.f32 %v254_v24, %v253_v20 }
 0x259   :  { %v251_v42 = vrot.slane %v250_v35, 1 }
 0x25a   :  { %v839_v61 = vpop.permute.xlu1 %627  ;;  %v222_v16 = vsel %vm197_vm10, %v220_v11, 0.0  ;;  %v229_v19 = vsel %vm197_vm10, %v221_v15, 0.0  ;;  %v256_v36 = vrot.slane %v255_v31, 2  ;;  %v548_v15 = vld [vmem:[%s882_s2] ss:$0 sm:$0xff] }
 0x25b   :  { %v629_v9 = vunpack.i.l.bf16 %v839_v61  ;;  %v630_v13 = vunpack.i.h.bf16 %v839_v61  ;;  %v223_v18 = vrot.slane %v222_v16, 4  ;;  %v230_v22 = vrot.slane %v229_v19, 4 }
 0x25c   :  { %v257_v43 = vadd.f32 %v256_v36, %v255_v31  ;;  %v252_v51 = vadd.f32 %v251_v42, %v250_v35  ;;  %v549_v31 = vld [vmem:[%s884_s4] ss:$0 sm:$0xff] }
 0x25d   :  { %v195_v14 = vmul.f32 %v629_v9, %v842_v7  ;;  %v196_v3 = vmul.f32 %v630_v13, %v186_v12  ;;  %v224_v23 = vadd.f32 %v223_v18, %v222_v16  ;;  %v231_v28 = vadd.f32 %v230_v22, %v229_v19 }
 0x25e   :  { %v258_v52 = vrot.slane %v257_v43, 1 }
 0x25f   :  { %v198_v4 = vsel %vm197_vm10, %v195_v14, 0.0  ;;  %v205_v21 = vsel %vm197_vm10, %v196_v3, 0.0  ;;  %v225_v29 = vrot.slane %v224_v23, 2  ;;  %v232_v33 = vrot.slane %v231_v28, 2  ;;  %v275_v57 = vpop.permute.xlu1 %274 }
 0x260   :  { %v199_v45 = vrot.slane %v198_v4, 4  ;;  %v206_v26 = vrot.slane %v205_v21, 4  ;;  %v259_v40 = vadd.f32 %v258_v52, %v257_v43 }
 0x261   :  { %v226_v34 = vadd.f32 %v225_v29, %v224_v23  ;;  %v233_v39 = vadd.f32 %v232_v33, %v231_v28 }
 0x262   :  { %v200_v27 = vadd.f32 %v199_v45, %v198_v4  ;;  %v207_v2 = vadd.f32 %v206_v26, %v205_v21 }
 0x263   :  { %v227_v41 = vrot.slane %v226_v34, 1  ;;  %v234_v50 = vrot.slane %v233_v39, 1 }
 0x264   :  { %v201_v32 = vrot.slane %v200_v27, 2  ;;  %v208_v37 = vrot.slane %v207_v2, 2 }
 0x265   :  { %v228_v49 = vadd.f32 %v227_v41, %v226_v34  ;;  %v235_v55 = vadd.f32 %v234_v50, %v233_v39 }
 0x266   :  { %v202_v38 = vadd.f32 %v201_v32, %v200_v27  ;;  %v209_v47 = vadd.f32 %v208_v37, %v207_v2 }
 0x267   :  { %v260_v56 = vadd.f32 %v252_v51, %v228_v49  ;;  %v261_v61 = vadd.f32 %v259_v40, %v235_v55 }
 0x268   :  { %v203_v48 = vrot.slane %v202_v38, 1  ;;  %v210_v53 = vrot.slane %v209_v47, 1 }
 0x269   :  { %v262_v62 = vmul.f32 %v629_v9, %v260_v56  ;;  %v263_v10 = vmul.f32 %v630_v13, %v261_v61 }
 0x26a   :  { %v204_v54 = vadd.f32 %v203_v48, %v202_v38  ;;  %v211_v59 = vadd.f32 %v210_v53, %v209_v47 }
 0x26c   :  { %v282_v60 = vmul.f32 %v275_v57, %v204_v54  ;;  %v283_v6 = vmul.f32 %v280_v63, %v211_v59 }
 0x26e   :  { %v284_v8 = vadd.f32 %v282_v60, %v262_v62  ;;  %v285_v11 = vadd.f32 %v283_v6, %v263_v10 }
 0x270   :  { %v286_v0 = vadd.f32 %v284_v8, %v842_v7  ;;  %v287_v14 = vadd.f32 %v285_v11, %v186_v12 }
 0x272   :  { %v288_v1 = vmul.f32 %v286_v0, %v837_v58  ;;  %v289_v5 = vmul.f32 %v287_v14, %v835_v46 }
 0x274   :  { %v297_v16 = vadd.f32 %v548_v15, %v288_v1  ;;  %v298_v3 = vadd.f32 %v548_v15, %v289_v5 }
 0x276   :  { %v299_v17 = vmax.f32 %v297_v16, 0.0  ;;  %v300_v13 = vmax.f32 %v298_v3, 0.0 }
 0x2a6   :  { %v418_v9 = vpop.permute.xlu1 %417 }
 0x2a7   :  { %v425_v4 = vmul.f32 %v418_v9, %v299_v17 }
 0x2a9   :  { %v427_v18 = vsel %vm197_vm10, %v425_v4, 0.0 }
 0x2aa   :  { %v428_v19 = vrot.slane %v427_v18, 4  ;;  %v423_v44 = vpop.permute.xlu1 %422 }
 0x2ab   :  { %v426_v7 = vmul.f32 %v423_v44, %v300_v13 }
 0x2ac   :  { %v429_v45 = vadd.f32 %v428_v19, %v427_v18 }
 0x2ad   :  { %v434_v58 = vsel %vm197_vm10, %v426_v7, 0.0 }
 0x2ae   :  { %v430_v12 = vrot.slane %v429_v45, 2  ;;  %v435_v20 = vrot.slane %v434_v58, 4 }
 0x2b0   :  { %v431_v21 = vadd.f32 %v430_v12, %v429_v45  ;;  %v436_v22 = vadd.f32 %v435_v20, %v434_v58 }
 0x2b2   :  { %v432_v23 = vrot.slane %v431_v21, 1  ;;  %v437_v24 = vrot.slane %v436_v22, 2 }
 0x2b4   :  { %v438_v46 = vadd.f32 %v437_v24, %v436_v22  ;;  %v433_v25 = vadd.f32 %v432_v23, %v431_v21 }
 0x2b6   :  { %v439_v26 = vrot.slane %v438_v46, 1  ;;  %v441_v28 = vmul.f32 0.125, %v433_v25 }
 0x2b8   :  { %v440_v27 = vadd.f32 %v439_v26, %v438_v46 }
 0x2ba   :  { %v442_v29 = vmul.f32 0.125, %v440_v27 }
 0x2bc   :  { %v457_v30 = vsel %vm456_vm11, %v442_v29, %v441_v28 }
 0x2bd   :  { %565 = vmatmul.mubr.msk.f32.vlgmr.msra.gmra.mrb[0].mxu0 %vm197_vm10, %v457_v30 }
 0x390   :  { %v526_v2 = vpop.f32.mrb[0].mxu0 }
 0x391   :  { %v527_v32 = vadd.f32 %v549_v31, %v526_v2  ;;  %v566_v33 = vpop.f32.mrb[1].mxu0 }
 0x393   :  { %531 = vst.msk [vmem:[#allocation2] sm:$0x3] %vm530_vm12, %v527_v32 }
 0x394   :  { %660 = shalt.err (!%p657_p4)
}
 0x395   :  { %s661_s15 = scalar_lea.hbm %s885_s5, 32 }
 0x396   :  { %p662_p5 = scmp.ne.s32.totalorder %s885_s5, %s661_s15  ;;  %p665_p6 = scmp.lt.u32.totalorder %s661_s15, %s885_s5 }
 0x398   :  { %p667_p7 = pnand %p665_p6, %p662_p5 }
 0x39a   :  { %670 = shalt.err (!%p667_p7)
}
 0x39b   :  { %541 = dma.vmem_to_hbm [thread:$0]  %s539_s11, 32, %s885_s5, [#allocation3]  }
 0x39c   :  { %671 = dma.done.wait [#allocation3], 32  }
 0x39d   :  { %672 = vsyncadd [#allocation3], 4294967264 }
 0x39e   :  { %545 = vsyncpa [#allocation3], 1 }

</bundles_post_ra>
